<compile_context>
chip_gen: v7x
topology: tpu7x:2x2x1
jax: 0.10.0
libtpu: 0.0.40
codegen_flags: <defaults>
</compile_context>

<pallas_src>
from functools import partial

import jax
import jax.numpy as jnp
from jax.experimental import pallas as pl
from jax.experimental.pallas import tpu as pltpu

EPS = 1e-6
BIG = 1e30            # masked min/max sentinel; finite, never overflows f32
_LANES = 128
_CHUNK = 32           # rows per in-kernel chunk; 32 keeps int8-mask sublane
                      # slices tile-aligned (int8 native tile = (32,128))
_TILE = _CHUNK * _LANES   # 4096 pixels of padding granularity


def _disparity(t, eps, need_inverse):
    """1/(t+eps) via EUP approx reciprocal + one Newton step (or identity)."""
    if not need_inverse:
        return t
    x = t + eps
    r = pl.reciprocal(x, approx=True)
    return r * (2.0 - x * r)          # Newton refinement -> ~f32-accurate


def _affine_loss_kernel(p_ref, t_ref, m_ref, out_ref, *, eps, need_inverse,
                        need_norm):
    # Block = one full image, lane-dense (1, R, 128); R is a multiple of 32.
    R = p_ref.shape[1]
    nch = R // _CHUNK                 # static trip count

    def load_chunk(c):
        base = pl.multiple_of(c * _CHUNK, _CHUNK)     # tile-aligned offsets
        pc = p_ref[0, pl.ds(base, _CHUNK), :].astype(jnp.float32)
        tc = t_ref[0, pl.ds(base, _CHUNK), :].astype(jnp.float32)
        mc = m_ref[0, pl.ds(base, _CHUNK), :].astype(jnp.float32)   # {0,1}
        return pc, tc, mc

    zeros = jnp.zeros((8, _LANES), jnp.float32)

    # ---------- pass 1: count, masked sums, masked min/max(td), min/max(p) ----
    def pass1(c, carry):
        cnt_a, std_a, sp_a, pmin_a, pmax_a, tmin_a, tmax_a = carry
        pc, tc, mc = load_chunk(c)
        for j in range(_CHUNK // 8):          # static unroll, vreg-sized slices
            sl = slice(j * 8, (j + 1) * 8)
            pj, mj = pc[sl], mc[sl]
            tdj = _disparity(tc[sl], eps, need_inverse)
            mb = mj > 0.0
            cnt_a = cnt_a + mj
            std_a = std_a + tdj * mj
            sp_a = sp_a + pj * mj
            pmin_a = jnp.minimum(pmin_a, pj)          # edge-padded: no masking
            pmax_a = jnp.maximum(pmax_a, pj)
            # (dead weight when need_norm=False: ~4 VPU ops / 1024 px)
            tmin_a = jnp.minimum(tmin_a, jnp.where(mb, tdj, BIG))
            tmax_a = jnp.maximum(tmax_a, jnp.where(mb, tdj, -BIG))
        return cnt_a, std_a, sp_a, pmin_a, pmax_a, tmin_a, tmax_a

    init = (zeros, zeros, zeros,
            jnp.full((8, _LANES), BIG, jnp.float32),
            jnp.full((8, _LANES), -BIG, jnp.float32),
            jnp.full((8, _LANES), BIG, jnp.float32),
            jnp.full((8, _LANES), -BIG, jnp.float32))
    cnt_a, std_a, sp_a, pmin_a, pmax_a, tmin_a, tmax_a = jax.lax.fori_loop(
        0, nch, pass1, init)

    cnt = jnp.sum(cnt_a)                      # valid-pixel count
    inv_cnt = 1.0 / jnp.maximum(cnt, 1.0)
    td_mean = jnp.sum(std_a) * inv_cnt
    p_mean = jnp.sum(sp_a) * inv_cnt
    inv_prange = 1.0 / (jnp.max(pmax_a) - jnp.min(pmin_a) + eps)
    if need_norm:
        inv_trange = 1.0 / (jnp.max(tmax_a) - jnp.min(tmin_a) + eps)
    else:
        inv_trange = jnp.float32(1.0)

    # ---------- pass 2: both masked MADs in one traversal ---------------------
    tdm_b = jnp.broadcast_to(td_mean, (8, _LANES))    # hoisted scalar splats
    pm_b = jnp.broadcast_to(p_mean, (8, _LANES))

    def pass2(c, carry):
        mt_a, mp_a = carry
        pc, tc, mc = load_chunk(c)
        for j in range(_CHUNK // 8):
            sl = slice(j * 8, (j + 1) * 8)
            pj, mj = pc[sl], mc[sl]
            tdj = _disparity(tc[sl], eps, need_inverse)
            mt_a = mt_a + jnp.abs(tdj - tdm_b) * mj
            mp_a = mp_a + jnp.abs(pj - pm_b) * mj
        return mt_a, mp_a

    mt_a, mp_a = jax.lax.fori_loop(0, nch, pass2, (zeros, zeros))
    td_mad = jnp.sum(mt_a) * inv_cnt
    p_mad = jnp.sum(mp_a) * inv_cnt

    # Min-max normalization + mean/MAD scaling folded into per-image scalars:
    #   st = m * alpha_t * (td - td_mean) ,  sp = m * alpha_p * (p - p_mean)
    alpha_t = inv_trange / (inv_trange * td_mad + eps)
    alpha_p = inv_prange / (inv_prange * p_mad + eps)
    shift = alpha_t * td_mean - alpha_p * p_mean

    at_b = jnp.broadcast_to(alpha_t, (8, _LANES))
    ap_b = jnp.broadcast_to(alpha_p, (8, _LANES))
    sh_b = jnp.broadcast_to(shift, (8, _LANES))

    # ---------- pass 3: sum of |sp - st| over masked pixels -------------------
    def pass3(c, sabs_a):
        pc, tc, mc = load_chunk(c)
        for j in range(_CHUNK // 8):
            sl = slice(j * 8, (j + 1) * 8)
            tdj = _disparity(tc[sl], eps, need_inverse)
            sabs_a = sabs_a + mc[sl] * jnp.abs(ap_b * pc[sl] - at_b * tdj + sh_b)
        return sabs_a

    sabs = jnp.sum(jax.lax.fori_loop(0, nch, pass3, zeros))

    # Lane/sublane-dense scalar slab: row 0 = sum|sp-st|, row 1 = mask count.
    row = jax.lax.broadcasted_iota(jnp.int32, (1, 8, _LANES), 1)
    out_ref[...] = jnp.where(row == 0, sabs,
                             jnp.where(row == 1, cnt, 0.0)).astype(jnp.float32)


def affine_invariant_loss_v2(predicted_depth, target_depth, mask, eps=EPS,
                             need_inverse=True, need_norm=True):
    """predicted_depth, target_depth: (B,H,W) float; mask: (B,H,W) bool/int."""
    # TODO(synk): `uncertainty` argument of the PyTorch module is not supported.
    B, H, W = predicted_depth.shape
    hw = H * W
    hw_pad = ((hw + _TILE - 1) // _TILE) * _TILE
    R = hw_pad // _LANES
    pad = hw_pad - hw

    def lane_dense(x, mode):
        x = x.reshape(B, hw)
        if pad:
            # TODO(synk): a body/tail split would avoid this full copy for
            # non-4096-aligned images; acceptable for now (aligned case is free).
            x = jnp.pad(x, ((0, 0), (0, pad)), mode=mode)
        return x.reshape(B, R, _LANES)

    # 'edge' pad keeps pred's padded pixels equal to a real pixel -> its
    # whole-image min/max needs no in-kernel pad masking.  Target/mask pads are
    # zeros -> padded pixels are masked out of every masked reduction.
    p = lane_dense(predicted_depth, "edge")
    t = lane_dense(target_depth, "constant")
    if mask.dtype in (jnp.int8, jnp.uint8):
        m8 = mask
    elif mask.dtype == jnp.bool_:
        # TODO(synk): pass the bool block straight through once Mosaic bool
        # inputs are guaranteed; this cast is one fused 2 B/px wrapper pass.
        m8 = mask.astype(jnp.int8)
    else:
        m8 = (mask != 0).astype(jnp.int8)
    m = lane_dense(m8, "constant")

    kernel = partial(_affine_loss_kernel, eps=float(eps),
                     need_inverse=bool(need_inverse), need_norm=bool(need_norm))

    img_spec = pl.BlockSpec((1, R, _LANES), lambda b: (b, 0, 0))
    out_spec = pl.BlockSpec((1, 8, _LANES), lambda b: (b, 0, 0))

    # VMEM: double-buffered whole-image input windows; in-kernel temporaries are
    # vreg-sized, so they do not scale with the image.  Cap at chip capacity
    # (128 MiB on v5e/v6e, 64 MiB on v7x) rather than a hard 64 MiB.
    in_bytes = hw_pad * (p.dtype.itemsize + t.dtype.itemsize + m.dtype.itemsize)
    try:
        cap = int(getattr(pltpu.get_tpu_info(), "vmem_capacity_bytes", 64 << 20))
    except Exception:
        cap = 64 << 20
    vmem_limit = int(min(max(2 * in_bytes + (2 << 20), 32 << 20), cap))

    out = pl.pallas_call(
        kernel,
        out_shape=jax.ShapeDtypeStruct((B, 8, _LANES), jnp.float32),
        grid_spec=pltpu.PrefetchScalarGridSpec(
            num_scalar_prefetch=0,
            grid=(B,),
            in_specs=[img_spec, img_spec, img_spec],
            out_specs=out_spec),
        compiler_params=pltpu.CompilerParams(
            dimension_semantics=("parallel",),
            vmem_limit_bytes=vmem_limit),
    )(p, t, m)

    sabs = out[:, 0, 0]
    cnt = out[:, 1, 0]
    valid = cnt > 0.0
    nvalid = jnp.sum(valid.astype(jnp.float32))
    total = jnp.sum(jnp.where(valid, sabs, 0.0))
    return jnp.where(nvalid > 0.0,
                     total / (jnp.maximum(nvalid, 1.0) * hw),
                     jnp.float32(0.0))


def _reference(pred, tgt, mask, eps=EPS, need_inverse=True, need_norm=True):
    """Pure-JAX reference mirroring the PyTorch semantics (vectorized)."""
    pred = pred.astype(jnp.float32)
    tgt = tgt.astype(jnp.float32)
    m = mask.astype(jnp.float32)

    cnt = jnp.sum(m, axis=(1, 2))
    safe = jnp.maximum(cnt, 1.0)

    td = 1.0 / (tgt + eps) if need_inverse else tgt
    if need_norm:
        tmin = jnp.min(jnp.where(m > 0, td, jnp.inf), axis=(1, 2), keepdims=True)
        tmax = jnp.max(jnp.where(m > 0, td, -jnp.inf), axis=(1, 2), keepdims=True)
        tn = (td - tmin) / (tmax - tmin + eps)
    else:
        tn = td
    tmed = (jnp.sum(tn * m, axis=(1, 2)) / safe)[:, None, None]
    tscale = (jnp.sum(jnp.abs(tn - tmed) * m, axis=(1, 2)) / safe)[:, None, None]
    st = (tn - tmed) / (tscale + eps) * m

    pmin = jnp.min(pred, axis=(1, 2), keepdims=True)
    pmax = jnp.max(pred, axis=(1, 2), keepdims=True)
    pn = (pred - pmin) / (pmax - pmin + eps)
    pmed = (jnp.sum(pn * m, axis=(1, 2)) / safe)[:, None, None]
    pscale = (jnp.sum(jnp.abs(pn - pmed) * m, axis=(1, 2)) / safe)[:, None, None]
    sp = (pn - pmed) / (pscale + eps) * m

    per_img = jnp.sum(jnp.abs(sp - st), axis=(1, 2))
    valid = cnt > 0
    nvalid = jnp.sum(valid.astype(jnp.float32))
    total = jnp.sum(jnp.where(valid, per_img, 0.0))
    hw = pred.shape[1] * pred.shape[2]
    return jnp.where(nvalid > 0, total / (nvalid * hw), 0.0)


if __name__ == "__main__":
    # Case 1: defaults (need_inverse=True, need_norm=True).
    key = jax.random.PRNGKey(0)
    k1, k2, k3 = jax.random.split(key, 3)
    B, H, W = 2, 16, 16
    predicted_depth = jax.random.uniform(k1, (B, H, W), jnp.float32, 0.5, 2.0)
    target_depth = jax.random.uniform(k2, (B, H, W), jnp.float32, 0.5, 2.0)
    mask = jax.random.bernoulli(k3, 0.7, (B, H, W))

    loss = jax.block_until_ready(
        affine_invariant_loss_v2(predicted_depth, target_depth, mask))
    ref = _reference(predicted_depth, target_depth, mask)
    assert jnp.allclose(loss, ref, rtol=1e-4, atol=1e-6), (loss, ref)

    # Case 2: non-aligned H*W (exercises edge/zero padding) + one empty-mask
    # image + need_inverse=False.
    k4, k5, k6 = jax.random.split(jax.random.PRNGKey(1), 3)
    B2, H2, W2 = 3, 7, 9
    pred2 = jax.random.uniform(k4, (B2, H2, W2), jnp.float32, 0.5, 2.0)
    tgt2 = jax.random.uniform(k5, (B2, H2, W2), jnp.float32, 0.5, 2.0)
    mask2 = jax.random.bernoulli(k6, 0.5, (B2, H2, W2))
    mask2 = mask2.at[1].set(False)   # image 1 is skipped (empty mask)

    loss2 = jax.block_until_ready(
        affine_invariant_loss_v2(pred2, tgt2, mask2, need_inverse=False))
    ref2 = _reference(pred2, tgt2, mask2, need_inverse=False)
    assert jnp.allclose(loss2, ref2, rtol=1e-4, atol=1e-6), (loss2, ref2)

    print("KERNEL_OK")
</pallas_src>

<mosaic_0001>
module attributes {stable_mosaic.version = 11 : i64} {
  func.func @_affine_loss_kernel(%arg0: i32, %arg1: memref<1x32x128xf32, #tpu.memory_space<vmem>>, %arg2: memref<1x32x128xf32, #tpu.memory_space<vmem>>, %arg3: memref<1x32x128xi8, #tpu.memory_space<vmem>>, %arg4: memref<1x8x128xf32, #tpu.memory_space<vmem>>) attributes {dimension_semantics = [#tpu.dimension_semantics<parallel>], iteration_bounds = array<i64: 2>, scalar_prefetch = 0 : i64, scratch_operands = 0 : i64, tpu.core_type = #tpu.core_type<tc>, window_params = [{transform_indices = @transform_0, window_bounds = array<i64: 1, 32, 128>}, {transform_indices = @transform_1, window_bounds = array<i64: 1, 32, 128>}, {transform_indices = @transform_2, window_bounds = array<i64: 1, 32, 128>}, {transform_indices = @transform_3, window_bounds = array<i64: 1, 8, 128>}]} {
    %cst = arith.constant 0.000000e+00 : f32
    %0 = vector.broadcast %cst : f32 to vector<8x128xf32>
    %cst_0 = arith.constant 1.000000e+30 : f32
    %1 = vector.broadcast %cst_0 : f32 to vector<8x128xf32>
    %cst_1 = arith.constant -1.000000e+30 : f32
    %2 = vector.broadcast %cst_1 : f32 to vector<8x128xf32>
    %cst_2 = arith.constant 1.000000e+30 : f32
    %3 = vector.broadcast %cst_2 : f32 to vector<8x128xf32>
    %cst_3 = arith.constant -1.000000e+30 : f32
    %4 = vector.broadcast %cst_3 : f32 to vector<8x128xf32>
    %c0_i32 = arith.constant 0 : i32
    %c32_i32 = arith.constant 32 : i32
    %5 = arith.muli %c0_i32, %c32_i32 : i32
    %6 = tpu.assume_multiple %5, 32 : i32
    %c0 = arith.constant 0 : index
    %7 = arith.index_cast %6 : i32 to index
    %c0_4 = arith.constant 0 : index
    %8 = vector.load %arg1[%c0, %7, %c0_4] : memref<1x32x128xf32, #tpu.memory_space<vmem>>, vector<1x32x128xf32>
    %9 = vector.shape_cast %8 : vector<1x32x128xf32> to vector<32x128xf32>
    %c0_5 = arith.constant 0 : index
    %10 = arith.index_cast %6 : i32 to index
    %c0_6 = arith.constant 0 : index
    %11 = vector.load %arg2[%c0_5, %10, %c0_6] : memref<1x32x128xf32, #tpu.memory_space<vmem>>, vector<1x32x128xf32>
    %12 = vector.shape_cast %11 : vector<1x32x128xf32> to vector<32x128xf32>
    %c0_7 = arith.constant 0 : index
    %13 = arith.index_cast %6 : i32 to index
    %c0_8 = arith.constant 0 : index
    %14 = vector.load %arg3[%c0_7, %13, %c0_8] : memref<1x32x128xi8, #tpu.memory_space<vmem>>, vector<1x32x128xi8>
    %15 = vector.shape_cast %14 : vector<1x32x128xi8> to vector<32x128xi8>
    %16 = arith.sitofp %15 : vector<32x128xi8> to vector<32x128xf32>
    %17 = vector.extract_strided_slice %9 {offsets = [0, 0], sizes = [8, 128], strides = [1, 1]} : vector<32x128xf32> to vector<8x128xf32>
    %18 = vector.extract_strided_slice %16 {offsets = [0, 0], sizes = [8, 128], strides = [1, 1]} : vector<32x128xf32> to vector<8x128xf32>
    %19 = vector.extract_strided_slice %12 {offsets = [0, 0], sizes = [8, 128], strides = [1, 1]} : vector<32x128xf32> to vector<8x128xf32>
    %cst_9 = arith.constant 9.99999997E-7 : f32
    %20 = vector.broadcast %cst_9 : f32 to vector<8x128xf32>
    %21 = arith.addf %19, %20 : vector<8x128xf32>
    %22 = tpu.reciprocal %21 {approx = true} : vector<8x128xf32> -> vector<8x128xf32>
    %23 = arith.mulf %21, %22 : vector<8x128xf32>
    %cst_10 = arith.constant 2.000000e+00 : f32
    %24 = vector.broadcast %cst_10 : f32 to vector<8x128xf32>
    %25 = arith.subf %24, %23 : vector<8x128xf32>
    %26 = arith.mulf %22, %25 : vector<8x128xf32>
    %cst_11 = arith.constant 0.000000e+00 : f32
    %27 = vector.broadcast %cst_11 : f32 to vector<8x128xf32>
    %28 = arith.cmpf ogt, %18, %27 : vector<8x128xf32>
    %29 = arith.addf %0, %18 : vector<8x128xf32>
    %30 = arith.mulf %26, %18 : vector<8x128xf32>
    %31 = arith.addf %0, %30 : vector<8x128xf32>
    %32 = arith.mulf %17, %18 : vector<8x128xf32>
    %33 = arith.addf %0, %32 : vector<8x128xf32>
    %34 = arith.minimumf %1, %17 : vector<8x128xf32>
    %35 = arith.maximumf %2, %17 : vector<8x128xf32>
    %cst_12 = arith.constant 1.000000e+30 : f32
    %36 = vector.broadcast %cst_12 : f32 to vector<8x128xf32>
    %37 = arith.select %28, %26, %36 : vector<8x128xi1>, vector<8x128xf32>
    %38 = arith.minimumf %3, %37 : vector<8x128xf32>
    %cst_13 = arith.constant -1.000000e+30 : f32
    %39 = vector.broadcast %cst_13 : f32 to vector<8x128xf32>
    %40 = arith.select %28, %26, %39 : vector<8x128xi1>, vector<8x128xf32>
    %41 = arith.maximumf %4, %40 : vector<8x128xf32>
    %42 = vector.extract_strided_slice %9 {offsets = [8, 0], sizes = [8, 128], strides = [1, 1]} : vector<32x128xf32> to vector<8x128xf32>
    %43 = vector.extract_strided_slice %16 {offsets = [8, 0], sizes = [8, 128], strides = [1, 1]} : vector<32x128xf32> to vector<8x128xf32>
    %44 = vector.extract_strided_slice %12 {offsets = [8, 0], sizes = [8, 128], strides = [1, 1]} : vector<32x128xf32> to vector<8x128xf32>
    %cst_14 = arith.constant 9.99999997E-7 : f32
    %45 = vector.broadcast %cst_14 : f32 to vector<8x128xf32>
    %46 = arith.addf %44, %45 : vector<8x128xf32>
    %47 = tpu.reciprocal %46 {approx = true} : vector<8x128xf32> -> vector<8x128xf32>
    %48 = arith.mulf %46, %47 : vector<8x128xf32>
    %cst_15 = arith.constant 2.000000e+00 : f32
    %49 = vector.broadcast %cst_15 : f32 to vector<8x128xf32>
    %50 = arith.subf %49, %48 : vector<8x128xf32>
    %51 = arith.mulf %47, %50 : vector<8x128xf32>
    %cst_16 = arith.constant 0.000000e+00 : f32
    %52 = vector.broadcast %cst_16 : f32 to vector<8x128xf32>
    %53 = arith.cmpf ogt, %43, %52 : vector<8x128xf32>
    %54 = arith.addf %29, %43 : vector<8x128xf32>
    %55 = arith.mulf %51, %43 : vector<8x128xf32>
    %56 = arith.addf %31, %55 : vector<8x128xf32>
    %57 = arith.mulf %42, %43 : vector<8x128xf32>
    %58 = arith.addf %33, %57 : vector<8x128xf32>
    %59 = arith.minimumf %34, %42 : vector<8x128xf32>
    %60 = arith.maximumf %35, %42 : vector<8x128xf32>
    %cst_17 = arith.constant 1.000000e+30 : f32
    %61 = vector.broadcast %cst_17 : f32 to vector<8x128xf32>
    %62 = arith.select %53, %51, %61 : vector<8x128xi1>, vector<8x128xf32>
    %63 = arith.minimumf %38, %62 : vector<8x128xf32>
    %cst_18 = arith.constant -1.000000e+30 : f32
    %64 = vector.broadcast %cst_18 : f32 to vector<8x128xf32>
    %65 = arith.select %53, %51, %64 : vector<8x128xi1>, vector<8x128xf32>
    %66 = arith.maximumf %41, %65 : vector<8x128xf32>
    %67 = vector.extract_strided_slice %9 {offsets = [16, 0], sizes = [8, 128], strides = [1, 1]} : vector<32x128xf32> to vector<8x128xf32>
    %68 = vector.extract_strided_slice %16 {offsets = [16, 0], sizes = [8, 128], strides = [1, 1]} : vector<32x128xf32> to vector<8x128xf32>
    %69 = vector.extract_strided_slice %12 {offsets = [16, 0], sizes = [8, 128], strides = [1, 1]} : vector<32x128xf32> to vector<8x128xf32>
    %cst_19 = arith.constant 9.99999997E-7 : f32
    %70 = vector.broadcast %cst_19 : f32 to vector<8x128xf32>
    %71 = arith.addf %69, %70 : vector<8x128xf32>
    %72 = tpu.reciprocal %71 {approx = true} : vector<8x128xf32> -> vector<8x128xf32>
    %73 = arith.mulf %71, %72 : vector<8x128xf32>
    %cst_20 = arith.constant 2.000000e+00 : f32
    %74 = vector.broadcast %cst_20 : f32 to vector<8x128xf32>
    %75 = arith.subf %74, %73 : vector<8x128xf32>
    %76 = arith.mulf %72, %75 : vector<8x128xf32>
    %cst_21 = arith.constant 0.000000e+00 : f32
    %77 = vector.broadcast %cst_21 : f32 to vector<8x128xf32>
    %78 = arith.cmpf ogt, %68, %77 : vector<8x128xf32>
    %79 = arith.addf %54, %68 : vector<8x128xf32>
    %80 = arith.mulf %76, %68 : vector<8x128xf32>
    %81 = arith.addf %56, %80 : vector<8x128xf32>
    %82 = arith.mulf %67, %68 : vector<8x128xf32>
    %83 = arith.addf %58, %82 : vector<8x128xf32>
    %84 = arith.minimumf %59, %67 : vector<8x128xf32>
    %85 = arith.maximumf %60, %67 : vector<8x128xf32>
    %cst_22 = arith.constant 1.000000e+30 : f32
    %86 = vector.broadcast %cst_22 : f32 to vector<8x128xf32>
    %87 = arith.select %78, %76, %86 : vector<8x128xi1>, vector<8x128xf32>
    %88 = arith.minimumf %63, %87 : vector<8x128xf32>
    %cst_23 = arith.constant -1.000000e+30 : f32
    %89 = vector.broadcast %cst_23 : f32 to vector<8x128xf32>
    %90 = arith.select %78, %76, %89 : vector<8x128xi1>, vector<8x128xf32>
    %91 = arith.maximumf %66, %90 : vector<8x128xf32>
    %92 = vector.extract_strided_slice %9 {offsets = [24, 0], sizes = [8, 128], strides = [1, 1]} : vector<32x128xf32> to vector<8x128xf32>
    %93 = vector.extract_strided_slice %16 {offsets = [24, 0], sizes = [8, 128], strides = [1, 1]} : vector<32x128xf32> to vector<8x128xf32>
    %94 = vector.extract_strided_slice %12 {offsets = [24, 0], sizes = [8, 128], strides = [1, 1]} : vector<32x128xf32> to vector<8x128xf32>
    %cst_24 = arith.constant 9.99999997E-7 : f32
    %95 = vector.broadcast %cst_24 : f32 to vector<8x128xf32>
    %96 = arith.addf %94, %95 : vector<8x128xf32>
    %97 = tpu.reciprocal %96 {approx = true} : vector<8x128xf32> -> vector<8x128xf32>
    %98 = arith.mulf %96, %97 : vector<8x128xf32>
    %cst_25 = arith.constant 2.000000e+00 : f32
    %99 = vector.broadcast %cst_25 : f32 to vector<8x128xf32>
    %100 = arith.subf %99, %98 : vector<8x128xf32>
    %101 = arith.mulf %97, %100 : vector<8x128xf32>
    %cst_26 = arith.constant 0.000000e+00 : f32
    %102 = vector.broadcast %cst_26 : f32 to vector<8x128xf32>
    %103 = arith.cmpf ogt, %93, %102 : vector<8x128xf32>
    %104 = arith.addf %79, %93 : vector<8x128xf32>
    %105 = arith.mulf %101, %93 : vector<8x128xf32>
    %106 = arith.addf %81, %105 : vector<8x128xf32>
    %107 = arith.mulf %92, %93 : vector<8x128xf32>
    %108 = arith.addf %83, %107 : vector<8x128xf32>
    %109 = arith.minimumf %84, %92 : vector<8x128xf32>
    %110 = arith.maximumf %85, %92 : vector<8x128xf32>
    %cst_27 = arith.constant 1.000000e+30 : f32
    %111 = vector.broadcast %cst_27 : f32 to vector<8x128xf32>
    %112 = arith.select %103, %101, %111 : vector<8x128xi1>, vector<8x128xf32>
    %113 = arith.minimumf %88, %112 : vector<8x128xf32>
    %cst_28 = arith.constant -1.000000e+30 : f32
    %114 = vector.broadcast %cst_28 : f32 to vector<8x128xf32>
    %115 = arith.select %103, %101, %114 : vector<8x128xi1>, vector<8x128xf32>
    %116 = arith.maximumf %91, %115 : vector<8x128xf32>
    %c1_i32 = arith.constant 1 : i32
    %117 = vector.shape_cast %104 : vector<8x128xf32> to vector<1x8x128xf32>
    %cst_29 = arith.constant dense<0.000000e+00> : vector<1xf32>
    %118 = vector.multi_reduction <add>, %117, %cst_29 [1, 2] : vector<1x8x128xf32> to vector<1xf32>
    %119 = vector.shape_cast %118 : vector<1xf32> to vector<1x1x1xf32>
    %120 = vector.extract %119[0, 0, 0] : f32 from vector<1x1x1xf32>
    %cst_30 = arith.constant 1.000000e+00 : f32
    %121 = arith.maximumf %120, %cst_30 : f32
    %cst_31 = arith.constant 1.000000e+00 : f32
    %122 = arith.divf %cst_31, %121 : f32
    %123 = vector.shape_cast %106 : vector<8x128xf32> to vector<1x8x128xf32>
    %cst_32 = arith.constant dense<0.000000e+00> : vector<1xf32>
    %124 = vector.multi_reduction <add>, %123, %cst_32 [1, 2] : vector<1x8x128xf32> to vector<1xf32>
    %125 = vector.shape_cast %124 : vector<1xf32> to vector<1x1x1xf32>
    %126 = vector.extract %125[0, 0, 0] : f32 from vector<1x1x1xf32>
    %127 = arith.mulf %126, %122 : f32
    %128 = vector.shape_cast %108 : vector<8x128xf32> to vector<1x8x128xf32>
    %cst_33 = arith.constant dense<0.000000e+00> : vector<1xf32>
    %129 = vector.multi_reduction <add>, %128, %cst_33 [1, 2] : vector<1x8x128xf32> to vector<1xf32>
    %130 = vector.shape_cast %129 : vector<1xf32> to vector<1x1x1xf32>
    %131 = vector.extract %130[0, 0, 0] : f32 from vector<1x1x1xf32>
    %132 = arith.mulf %131, %122 : f32
    %133 = vector.shape_cast %110 : vector<8x128xf32> to vector<1x8x128xf32>
    %cst_34 = arith.constant dense<0xFF800000> : vector<1xf32>
    %134 = vector.multi_reduction <maximumf>, %133, %cst_34 [1, 2] : vector<1x8x128xf32> to vector<1xf32>
    %135 = vector.shape_cast %134 : vector<1xf32> to vector<1x1x1xf32>
    %136 = vector.extract %135[0, 0, 0] : f32 from vector<1x1x1xf32>
    %137 = vector.shape_cast %109 : vector<8x128xf32> to vector<1x8x128xf32>
    %cst_35 = arith.constant dense<0x7F800000> : vector<1xf32>
    %138 = vector.multi_reduction <minimumf>, %137, %cst_35 [1, 2] : vector<1x8x128xf32> to vector<1xf32>
    %139 = vector.shape_cast %138 : vector<1xf32> to vector<1x1x1xf32>
    %140 = vector.extract %139[0, 0, 0] : f32 from vector<1x1x1xf32>
    %141 = arith.subf %136, %140 : f32
    %cst_36 = arith.constant 9.99999997E-7 : f32
    %142 = arith.addf %141, %cst_36 : f32
    %cst_37 = arith.constant 1.000000e+00 : f32
    %143 = arith.divf %cst_37, %142 : f32
    %144 = vector.shape_cast %116 : vector<8x128xf32> to vector<1x8x128xf32>
    %cst_38 = arith.constant dense<0xFF800000> : vector<1xf32>
    %145 = vector.multi_reduction <maximumf>, %144, %cst_38 [1, 2] : vector<1x8x128xf32> to vector<1xf32>
    %146 = vector.shape_cast %145 : vector<1xf32> to vector<1x1x1xf32>
    %147 = vector.extract %146[0, 0, 0] : f32 from vector<1x1x1xf32>
    %148 = vector.shape_cast %113 : vector<8x128xf32> to vector<1x8x128xf32>
    %cst_39 = arith.constant dense<0x7F800000> : vector<1xf32>
    %149 = vector.multi_reduction <minimumf>, %148, %cst_39 [1, 2] : vector<1x8x128xf32> to vector<1xf32>
    %150 = vector.shape_cast %149 : vector<1xf32> to vector<1x1x1xf32>
    %151 = vector.extract %150[0, 0, 0] : f32 from vector<1x1x1xf32>
    %152 = arith.subf %147, %151 : f32
    %cst_40 = arith.constant 9.99999997E-7 : f32
    %153 = arith.addf %152, %cst_40 : f32
    %cst_41 = arith.constant 1.000000e+00 : f32
    %154 = arith.divf %cst_41, %153 : f32
    %155 = vector.broadcast %127 : f32 to vector<8x128xf32>
    %156 = vector.broadcast %132 : f32 to vector<8x128xf32>
    %c0_i32_42 = arith.constant 0 : i32
    %c32_i32_43 = arith.constant 32 : i32
    %157 = arith.muli %c0_i32_42, %c32_i32_43 : i32
    %158 = tpu.assume_multiple %157, 32 : i32
    %c0_44 = arith.constant 0 : index
    %159 = arith.index_cast %158 : i32 to index
    %c0_45 = arith.constant 0 : index
    %160 = vector.load %arg1[%c0_44, %159, %c0_45] : memref<1x32x128xf32, #tpu.memory_space<vmem>>, vector<1x32x128xf32>
    %161 = vector.shape_cast %160 : vector<1x32x128xf32> to vector<32x128xf32>
    %c0_46 = arith.constant 0 : index
    %162 = arith.index_cast %158 : i32 to index
    %c0_47 = arith.constant 0 : index
    %163 = vector.load %arg2[%c0_46, %162, %c0_47] : memref<1x32x128xf32, #tpu.memory_space<vmem>>, vector<1x32x128xf32>
    %164 = vector.shape_cast %163 : vector<1x32x128xf32> to vector<32x128xf32>
    %c0_48 = arith.constant 0 : index
    %165 = arith.index_cast %158 : i32 to index
    %c0_49 = arith.constant 0 : index
    %166 = vector.load %arg3[%c0_48, %165, %c0_49] : memref<1x32x128xi8, #tpu.memory_space<vmem>>, vector<1x32x128xi8>
    %167 = vector.shape_cast %166 : vector<1x32x128xi8> to vector<32x128xi8>
    %168 = arith.sitofp %167 : vector<32x128xi8> to vector<32x128xf32>
    %169 = vector.extract_strided_slice %161 {offsets = [0, 0], sizes = [8, 128], strides = [1, 1]} : vector<32x128xf32> to vector<8x128xf32>
    %170 = vector.extract_strided_slice %168 {offsets = [0, 0], sizes = [8, 128], strides = [1, 1]} : vector<32x128xf32> to vector<8x128xf32>
    %171 = vector.extract_strided_slice %164 {offsets = [0, 0], sizes = [8, 128], strides = [1, 1]} : vector<32x128xf32> to vector<8x128xf32>
    %cst_50 = arith.constant 9.99999997E-7 : f32
    %172 = vector.broadcast %cst_50 : f32 to vector<8x128xf32>
    %173 = arith.addf %171, %172 : vector<8x128xf32>
    %174 = tpu.reciprocal %173 {approx = true} : vector<8x128xf32> -> vector<8x128xf32>
    %175 = arith.mulf %173, %174 : vector<8x128xf32>
    %cst_51 = arith.constant 2.000000e+00 : f32
    %176 = vector.broadcast %cst_51 : f32 to vector<8x128xf32>
    %177 = arith.subf %176, %175 : vector<8x128xf32>
    %178 = arith.mulf %174, %177 : vector<8x128xf32>
    %179 = arith.subf %178, %155 : vector<8x128xf32>
    %180 = math.absf %179 : vector<8x128xf32>
    %181 = arith.mulf %180, %170 : vector<8x128xf32>
    %182 = arith.addf %0, %181 : vector<8x128xf32>
    %183 = arith.subf %169, %156 : vector<8x128xf32>
    %184 = math.absf %183 : vector<8x128xf32>
    %185 = arith.mulf %184, %170 : vector<8x128xf32>
    %186 = arith.addf %0, %185 : vector<8x128xf32>
    %187 = vector.extract_strided_slice %161 {offsets = [8, 0], sizes = [8, 128], strides = [1, 1]} : vector<32x128xf32> to vector<8x128xf32>
    %188 = vector.extract_strided_slice %168 {offsets = [8, 0], sizes = [8, 128], strides = [1, 1]} : vector<32x128xf32> to vector<8x128xf32>
    %189 = vector.extract_strided_slice %164 {offsets = [8, 0], sizes = [8, 128], strides = [1, 1]} : vector<32x128xf32> to vector<8x128xf32>
    %cst_52 = arith.constant 9.99999997E-7 : f32
    %190 = vector.broadcast %cst_52 : f32 to vector<8x128xf32>
    %191 = arith.addf %189, %190 : vector<8x128xf32>
    %192 = tpu.reciprocal %191 {approx = true} : vector<8x128xf32> -> vector<8x128xf32>
    %193 = arith.mulf %191, %192 : vector<8x128xf32>
    %cst_53 = arith.constant 2.000000e+00 : f32
    %194 = vector.broadcast %cst_53 : f32 to vector<8x128xf32>
    %195 = arith.subf %194, %193 : vector<8x128xf32>
    %196 = arith.mulf %192, %195 : vector<8x128xf32>
    %197 = arith.subf %196, %155 : vector<8x128xf32>
    %198 = math.absf %197 : vector<8x128xf32>
    %199 = arith.mulf %198, %188 : vector<8x128xf32>
    %200 = arith.addf %182, %199 : vector<8x128xf32>
    %201 = arith.subf %187, %156 : vector<8x128xf32>
    %202 = math.absf %201 : vector<8x128xf32>
    %203 = arith.mulf %202, %188 : vector<8x128xf32>
    %204 = arith.addf %186, %203 : vector<8x128xf32>
    %205 = vector.extract_strided_slice %161 {offsets = [16, 0], sizes = [8, 128], strides = [1, 1]} : vector<32x128xf32> to vector<8x128xf32>
    %206 = vector.extract_strided_slice %168 {offsets = [16, 0], sizes = [8, 128], strides = [1, 1]} : vector<32x128xf32> to vector<8x128xf32>
    %207 = vector.extract_strided_slice %164 {offsets = [16, 0], sizes = [8, 128], strides = [1, 1]} : vector<32x128xf32> to vector<8x128xf32>
    %cst_54 = arith.constant 9.99999997E-7 : f32
    %208 = vector.broadcast %cst_54 : f32 to vector<8x128xf32>
    %209 = arith.addf %207, %208 : vector<8x128xf32>
    %210 = tpu.reciprocal %209 {approx = true} : vector<8x128xf32> -> vector<8x128xf32>
    %211 = arith.mulf %209, %210 : vector<8x128xf32>
    %cst_55 = arith.constant 2.000000e+00 : f32
    %212 = vector.broadcast %cst_55 : f32 to vector<8x128xf32>
    %213 = arith.subf %212, %211 : vector<8x128xf32>
    %214 = arith.mulf %210, %213 : vector<8x128xf32>
    %215 = arith.subf %214, %155 : vector<8x128xf32>
    %216 = math.absf %215 : vector<8x128xf32>
    %217 = arith.mulf %216, %206 : vector<8x128xf32>
    %218 = arith.addf %200, %217 : vector<8x128xf32>
    %219 = arith.subf %205, %156 : vector<8x128xf32>
    %220 = math.absf %219 : vector<8x128xf32>
    %221 = arith.mulf %220, %206 : vector<8x128xf32>
    %222 = arith.addf %204, %221 : vector<8x128xf32>
    %223 = vector.extract_strided_slice %161 {offsets = [24, 0], sizes = [8, 128], strides = [1, 1]} : vector<32x128xf32> to vector<8x128xf32>
    %224 = vector.extract_strided_slice %168 {offsets = [24, 0], sizes = [8, 128], strides = [1, 1]} : vector<32x128xf32> to vector<8x128xf32>
    %225 = vector.extract_strided_slice %164 {offsets = [24, 0], sizes = [8, 128], strides = [1, 1]} : vector<32x128xf32> to vector<8x128xf32>
    %cst_56 = arith.constant 9.99999997E-7 : f32
    %226 = vector.broadcast %cst_56 : f32 to vector<8x128xf32>
    %227 = arith.addf %225, %226 : vector<8x128xf32>
    %228 = tpu.reciprocal %227 {approx = true} : vector<8x128xf32> -> vector<8x128xf32>
    %229 = arith.mulf %227, %228 : vector<8x128xf32>
    %cst_57 = arith.constant 2.000000e+00 : f32
    %230 = vector.broadcast %cst_57 : f32 to vector<8x128xf32>
    %231 = arith.subf %230, %229 : vector<8x128xf32>
    %232 = arith.mulf %228, %231 : vector<8x128xf32>
    %233 = arith.subf %232, %155 : vector<8x128xf32>
    %234 = math.absf %233 : vector<8x128xf32>
    %235 = arith.mulf %234, %224 : vector<8x128xf32>
    %236 = arith.addf %218, %235 : vector<8x128xf32>
    %237 = arith.subf %223, %156 : vector<8x128xf32>
    %238 = math.absf %237 : vector<8x128xf32>
    %239 = arith.mulf %238, %224 : vector<8x128xf32>
    %240 = arith.addf %222, %239 : vector<8x128xf32>
    %c1_i32_58 = arith.constant 1 : i32
    %241 = vector.shape_cast %236 : vector<8x128xf32> to vector<1x8x128xf32>
    %cst_59 = arith.constant dense<0.000000e+00> : vector<1xf32>
    %242 = vector.multi_reduction <add>, %241, %cst_59 [1, 2] : vector<1x8x128xf32> to vector<1xf32>
    %243 = vector.shape_cast %242 : vector<1xf32> to vector<1x1x1xf32>
    %244 = vector.extract %243[0, 0, 0] : f32 from vector<1x1x1xf32>
    %245 = arith.mulf %244, %122 : f32
    %246 = vector.shape_cast %240 : vector<8x128xf32> to vector<1x8x128xf32>
    %cst_60 = arith.constant dense<0.000000e+00> : vector<1xf32>
    %247 = vector.multi_reduction <add>, %246, %cst_60 [1, 2] : vector<1x8x128xf32> to vector<1xf32>
    %248 = vector.shape_cast %247 : vector<1xf32> to vector<1x1x1xf32>
    %249 = vector.extract %248[0, 0, 0] : f32 from vector<1x1x1xf32>
    %250 = arith.mulf %249, %122 : f32
    %251 = arith.mulf %154, %245 : f32
    %cst_61 = arith.constant 9.99999997E-7 : f32
    %252 = arith.addf %251, %cst_61 : f32
    %253 = arith.divf %154, %252 : f32
    %254 = arith.mulf %143, %250 : f32
    %cst_62 = arith.constant 9.99999997E-7 : f32
    %255 = arith.addf %254, %cst_62 : f32
    %256 = arith.divf %143, %255 : f32
    %257 = arith.mulf %253, %127 : f32
    %258 = arith.mulf %256, %132 : f32
    %259 = arith.subf %257, %258 : f32
    %260 = vector.broadcast %253 : f32 to vector<8x128xf32>
    %261 = vector.broadcast %256 : f32 to vector<8x128xf32>
    %262 = vector.broadcast %259 : f32 to vector<8x128xf32>
    %c0_i32_63 = arith.constant 0 : i32
    %c32_i32_64 = arith.constant 32 : i32
    %263 = arith.muli %c0_i32_63, %c32_i32_64 : i32
    %264 = tpu.assume_multiple %263, 32 : i32
    %c0_65 = arith.constant 0 : index
    %265 = arith.index_cast %264 : i32 to index
    %c0_66 = arith.constant 0 : index
    %266 = vector.load %arg1[%c0_65, %265, %c0_66] : memref<1x32x128xf32, #tpu.memory_space<vmem>>, vector<1x32x128xf32>
    %267 = vector.shape_cast %266 : vector<1x32x128xf32> to vector<32x128xf32>
    %c0_67 = arith.constant 0 : index
    %268 = arith.index_cast %264 : i32 to index
    %c0_68 = arith.constant 0 : index
    %269 = vector.load %arg2[%c0_67, %268, %c0_68] : memref<1x32x128xf32, #tpu.memory_space<vmem>>, vector<1x32x128xf32>
    %270 = vector.shape_cast %269 : vector<1x32x128xf32> to vector<32x128xf32>
    %c0_69 = arith.constant 0 : index
    %271 = arith.index_cast %264 : i32 to index
    %c0_70 = arith.constant 0 : index
    %272 = vector.load %arg3[%c0_69, %271, %c0_70] : memref<1x32x128xi8, #tpu.memory_space<vmem>>, vector<1x32x128xi8>
    %273 = vector.shape_cast %272 : vector<1x32x128xi8> to vector<32x128xi8>
    %274 = arith.sitofp %273 : vector<32x128xi8> to vector<32x128xf32>
    %275 = vector.extract_strided_slice %270 {offsets = [0, 0], sizes = [8, 128], strides = [1, 1]} : vector<32x128xf32> to vector<8x128xf32>
    %cst_71 = arith.constant 9.99999997E-7 : f32
    %276 = vector.broadcast %cst_71 : f32 to vector<8x128xf32>
    %277 = arith.addf %275, %276 : vector<8x128xf32>
    %278 = tpu.reciprocal %277 {approx = true} : vector<8x128xf32> -> vector<8x128xf32>
    %279 = arith.mulf %277, %278 : vector<8x128xf32>
    %cst_72 = arith.constant 2.000000e+00 : f32
    %280 = vector.broadcast %cst_72 : f32 to vector<8x128xf32>
    %281 = arith.subf %280, %279 : vector<8x128xf32>
    %282 = arith.mulf %278, %281 : vector<8x128xf32>
    %283 = vector.extract_strided_slice %274 {offsets = [0, 0], sizes = [8, 128], strides = [1, 1]} : vector<32x128xf32> to vector<8x128xf32>
    %284 = vector.extract_strided_slice %267 {offsets = [0, 0], sizes = [8, 128], strides = [1, 1]} : vector<32x128xf32> to vector<8x128xf32>
    %285 = arith.mulf %261, %284 : vector<8x128xf32>
    %286 = arith.mulf %260, %282 : vector<8x128xf32>
    %287 = arith.subf %285, %286 : vector<8x128xf32>
    %288 = arith.addf %287, %262 : vector<8x128xf32>
    %289 = math.absf %288 : vector<8x128xf32>
    %290 = arith.mulf %283, %289 : vector<8x128xf32>
    %291 = arith.addf %0, %290 : vector<8x128xf32>
    %292 = vector.extract_strided_slice %270 {offsets = [8, 0], sizes = [8, 128], strides = [1, 1]} : vector<32x128xf32> to vector<8x128xf32>
    %cst_73 = arith.constant 9.99999997E-7 : f32
    %293 = vector.broadcast %cst_73 : f32 to vector<8x128xf32>
    %294 = arith.addf %292, %293 : vector<8x128xf32>
    %295 = tpu.reciprocal %294 {approx = true} : vector<8x128xf32> -> vector<8x128xf32>
    %296 = arith.mulf %294, %295 : vector<8x128xf32>
    %cst_74 = arith.constant 2.000000e+00 : f32
    %297 = vector.broadcast %cst_74 : f32 to vector<8x128xf32>
    %298 = arith.subf %297, %296 : vector<8x128xf32>
    %299 = arith.mulf %295, %298 : vector<8x128xf32>
    %300 = vector.extract_strided_slice %274 {offsets = [8, 0], sizes = [8, 128], strides = [1, 1]} : vector<32x128xf32> to vector<8x128xf32>
    %301 = vector.extract_strided_slice %267 {offsets = [8, 0], sizes = [8, 128], strides = [1, 1]} : vector<32x128xf32> to vector<8x128xf32>
    %302 = arith.mulf %261, %301 : vector<8x128xf32>
    %303 = arith.mulf %260, %299 : vector<8x128xf32>
    %304 = arith.subf %302, %303 : vector<8x128xf32>
    %305 = arith.addf %304, %262 : vector<8x128xf32>
    %306 = math.absf %305 : vector<8x128xf32>
    %307 = arith.mulf %300, %306 : vector<8x128xf32>
    %308 = arith.addf %291, %307 : vector<8x128xf32>
    %309 = vector.extract_strided_slice %270 {offsets = [16, 0], sizes = [8, 128], strides = [1, 1]} : vector<32x128xf32> to vector<8x128xf32>
    %cst_75 = arith.constant 9.99999997E-7 : f32
    %310 = vector.broadcast %cst_75 : f32 to vector<8x128xf32>
    %311 = arith.addf %309, %310 : vector<8x128xf32>
    %312 = tpu.reciprocal %311 {approx = true} : vector<8x128xf32> -> vector<8x128xf32>
    %313 = arith.mulf %311, %312 : vector<8x128xf32>
    %cst_76 = arith.constant 2.000000e+00 : f32
    %314 = vector.broadcast %cst_76 : f32 to vector<8x128xf32>
    %315 = arith.subf %314, %313 : vector<8x128xf32>
    %316 = arith.mulf %312, %315 : vector<8x128xf32>
    %317 = vector.extract_strided_slice %274 {offsets = [16, 0], sizes = [8, 128], strides = [1, 1]} : vector<32x128xf32> to vector<8x128xf32>
    %318 = vector.extract_strided_slice %267 {offsets = [16, 0], sizes = [8, 128], strides = [1, 1]} : vector<32x128xf32> to vector<8x128xf32>
    %319 = arith.mulf %261, %318 : vector<8x128xf32>
    %320 = arith.mulf %260, %316 : vector<8x128xf32>
    %321 = arith.subf %319, %320 : vector<8x128xf32>
    %322 = arith.addf %321, %262 : vector<8x128xf32>
    %323 = math.absf %322 : vector<8x128xf32>
    %324 = arith.mulf %317, %323 : vector<8x128xf32>
    %325 = arith.addf %308, %324 : vector<8x128xf32>
    %326 = vector.extract_strided_slice %270 {offsets = [24, 0], sizes = [8, 128], strides = [1, 1]} : vector<32x128xf32> to vector<8x128xf32>
    %cst_77 = arith.constant 9.99999997E-7 : f32
    %327 = vector.broadcast %cst_77 : f32 to vector<8x128xf32>
    %328 = arith.addf %326, %327 : vector<8x128xf32>
    %329 = tpu.reciprocal %328 {approx = true} : vector<8x128xf32> -> vector<8x128xf32>
    %330 = arith.mulf %328, %329 : vector<8x128xf32>
    %cst_78 = arith.constant 2.000000e+00 : f32
    %331 = vector.broadcast %cst_78 : f32 to vector<8x128xf32>
    %332 = arith.subf %331, %330 : vector<8x128xf32>
    %333 = arith.mulf %329, %332 : vector<8x128xf32>
    %334 = vector.extract_strided_slice %274 {offsets = [24, 0], sizes = [8, 128], strides = [1, 1]} : vector<32x128xf32> to vector<8x128xf32>
    %335 = vector.extract_strided_slice %267 {offsets = [24, 0], sizes = [8, 128], strides = [1, 1]} : vector<32x128xf32> to vector<8x128xf32>
    %336 = arith.mulf %261, %335 : vector<8x128xf32>
    %337 = arith.mulf %260, %333 : vector<8x128xf32>
    %338 = arith.subf %336, %337 : vector<8x128xf32>
    %339 = arith.addf %338, %262 : vector<8x128xf32>
    %340 = math.absf %339 : vector<8x128xf32>
    %341 = arith.mulf %334, %340 : vector<8x128xf32>
    %342 = arith.addf %325, %341 : vector<8x128xf32>
    %c1_i32_79 = arith.constant 1 : i32
    %343 = vector.shape_cast %342 : vector<8x128xf32> to vector<1x8x128xf32>
    %cst_80 = arith.constant dense<0.000000e+00> : vector<1xf32>
    %344 = vector.multi_reduction <add>, %343, %cst_80 [1, 2] : vector<1x8x128xf32> to vector<1xf32>
    %345 = vector.shape_cast %344 : vector<1xf32> to vector<1x1x1xf32>
    %346 = vector.extract %345[0, 0, 0] : f32 from vector<1x1x1xf32>
    %347 = tpu.iota {dimensions = array<i32: 1>} : vector<1x8x128xi32>
    %c0_i32_81 = arith.constant 0 : i32
    %348 = vector.broadcast %c0_i32_81 : i32 to vector<1x8x128xi32>
    %349 = arith.cmpi eq, %347, %348 : vector<1x8x128xi32>
    %c1_i32_82 = arith.constant 1 : i32
    %350 = vector.broadcast %c1_i32_82 : i32 to vector<1x8x128xi32>
    %351 = arith.cmpi eq, %347, %350 : vector<1x8x128xi32>
    %cst_83 = arith.constant 0.000000e+00 : f32
    %352 = vector.broadcast %120 : f32 to vector<1x8x128xf32>
    %353 = vector.broadcast %cst_83 : f32 to vector<1x8x128xf32>
    %354 = arith.select %351, %352, %353 : vector<1x8x128xi1>, vector<1x8x128xf32>
    %355 = vector.broadcast %346 : f32 to vector<1x8x128xf32>
    %356 = arith.select %349, %355, %354 : vector<1x8x128xi1>, vector<1x8x128xf32>
    %c0_84 = arith.constant 0 : index
    %c0_85 = arith.constant 0 : index
    %c0_86 = arith.constant 0 : index
    %357 = vector.load %arg4[%c0_84, %c0_85, %c0_86] : memref<1x8x128xf32, #tpu.memory_space<vmem>>, vector<1x8x128xf32>
    tpu.vector_store %arg4[%c0_84, %c0_85, %c0_86], %356 {strides = array<i32>} : memref<1x8x128xf32, #tpu.memory_space<vmem>>, vector<1x8x128xf32>,
    return
  }
  func.func @transform_0(%arg0: i32) -> (i32, i32, i32) {
    %c0_i32 = arith.constant 0 : i32
    %c0_i32_0 = arith.constant 0 : i32
    %c0_i32_1 = arith.constant 0 : i32
    return %arg0, %c0_i32, %c0_i32_0 : i32, i32, i32
  }
  func.func @transform_1(%arg0: i32) -> (i32, i32, i32) {
    %c0_i32 = arith.constant 0 : i32
    %c0_i32_0 = arith.constant 0 : i32
    %c0_i32_1 = arith.constant 0 : i32
    return %arg0, %c0_i32, %c0_i32_0 : i32, i32, i32
  }
  func.func @transform_2(%arg0: i32) -> (i32, i32, i32) {
    %c0_i32 = arith.constant 0 : i32
    %c0_i32_0 = arith.constant 0 : i32
    %c0_i32_1 = arith.constant 0 : i32
    return %arg0, %c0_i32, %c0_i32_0 : i32, i32, i32
  }
  func.func @transform_3(%arg0: i32) -> (i32, i32, i32) {
    %c0_i32 = arith.constant 0 : i32
    %c0_i32_0 = arith.constant 0 : i32
    %c0_i32_1 = arith.constant 0 : i32
    return %arg0, %c0_i32, %c0_i32_0 : i32, i32, i32
  }
}

</mosaic_0001>

<bundles_post_ra>
// kernel: tpu_custom_call.1
= control target key start
LH: loop header
LB: loop body
LE: loop exit
PB: predicated region body
PF: predicated region fallthrough
CT: control target
= control target key end

     0   :  { %s1360_s0 = inlined_call_operand.hbm [shape: f32[2,32,128], index: 0, kind: input, shape index: {}]   ;;  %s1361_s1 = inlined_call_operand.hbm [shape: f32[2,32,128], index: 1, kind: input, shape index: {}]   ;;  %s1362_s2 = inlined_call_operand.hbm [shape: s8[2,32,128], index: 2, kind: input, shape index: {}]   ;;  %s1363_s3 = inlined_call_operand.hbm [shape: f32[2,8,128], index: 3, kind: output, shape index: {}]  }
   0x1   :  { %1369 = sst [smem:[#allocation12_spill]] %s1360_s0 }
   0x2   :  { %8 = vsyncpa [#allocation3], 0 }
   0x3   :  { %10 = vsyncpa [#allocation3 + $0x1], 0 }
   0x4   :  { %11 = vsyncpa [#allocation6], 0 }
   0x5   :  { %13 = vsyncpa [#allocation6 + $0x1], 0 }
   0x6   :  { %14 = vsyncpa [#allocation4], 0 }
   0x7   :  { %16 = vsyncpa [#allocation4 + $0x1], 0  ;;  %s990_s12 = smov 0   ;;  %s992_s13 = smov 0  }
   0x8   :  { %s994_s14 = smov 0   ;;  %s996_s15 = smov 0  }
   0x9 LB: > { %s1011_s16 = sadd.s32 4294967295, %s961_s15   ;;  %s672_s17 = sadd.s32 4294967294, %s961_s15   ;;  %s961_s15 = sphi %s996_s15, %s1389_s15   ;;  %s957_s14 = sphi %s994_s14, %s1388_s14   ;;  %s953_s13 = sphi %s992_s13, %s1387_s13   ;;  %s949_s12 = sphi %s990_s12, %s1386_s12  }
   0xa   : > { %s1015_s18 = sadd.s32 1, %s961_s15   ;;  %s29_s19 = sadd.s32 1, %s957_s14 }
   0xb   : > { %s26_s20 = ssub.s32 %s961_s15, %s1015_s18  ;;  %p36_p0 = scmp.ne.s32.totalorder %s957_s14, %s953_s13 }
   0xc   : > { %p27_p1 = scmp.eq.s32.totalorder %s26_s20, 0  ;;  %p37_p2 = scmp.eq.s32.totalorder %s961_s15, 0 }
   0xd   : > { %p42_p3 = scmp.ne.s32.totalorder %s953_s13, %s949_s12  ;;  %p43_p4 = scmp.eq.s32.totalorder %s1011_s16, 0 }
   0xe   : > { %s1027_s21 = scalar_select %p27_p1, %s957_s14, %s29_s19  }
   0xf   : > { %p38_p5 = por %p37_p2, %p36_p0  ;;  %p1029_p6 = por %p43_p4, %p42_p3 }
  0x10   : > { %p118_p7 = scmp.eq.s32.totalorder %s1011_s16, 1  ;;  %p124_p8 = scmp.eq.s32.totalorder %s672_s17, 1 }
  0x11   : > { %s1370_s22 = scalar_select %p1029_p6, 1, 0 }
  0x12   : > { %p746_p10 = scmp.lt.s32.totalorder %s961_s15, 2  ;;  %p1036_p11 = por %p118_p7, %p36_p0 }
  0x13   : > { %p1040_p12 = por %p124_p8, %p42_p3  ;;  %s1045_s25 = sand.u32 1, %s957_s14  }
  0x14   : > { %s1371_s23 = scalar_select %p1036_p11, 1, 0 }
  0x15   : > { %s1372_s24 = scalar_select %p1040_p12, 1, 0 }
  0x16   : > { %s692_s26 = sshll.u32 %s961_s15, 9  ;;  %s675_s27 = sshll.u32 %s1045_s25, 5 }
  0x17   : > { %p1049_p13 = pnand %p746_p10, %p38_p5  ;;  %s165_s29 = sand.u32 1, %s961_s15  }
  0x18   : > { %s1059_s5 = scalar_lea.hbm %s1361_s1, %s692_s26  ;;  %s169_s6 = scalar_lea.vmem [#allocation5], %s675_s27 }
  0x19   : > { %s1373_s28 = scalar_select %p1049_p13, 1, 0 }
  0x1a   : > { %s176_s7 = sshll.u32 %s169_s6, 4  ;;  %s1066_s8 = scalar_lea.sflag [#allocation6], %s165_s29  ;;  %s1063_s7 = int_to_ptr.vmem [resolvable:$true] %s176_s7 }
  0x1b   : > { %s801_s9 = scalar_lea.hbm %s1059_s5, 512  ;;  %p1072_p2 = pneg %p1049_p13 }
  0x1c   : > { %p802_p1 = scmp.ne.s32.totalorder %s1059_s5, %s801_s9  ;;  %s806_s19 = scalar_lea.hbm %s1361_s1, 1024 }
  0x1d   : > { %p807_p5 = scmp.lt.u32.totalorder %s1059_s5, %s1361_s1  ;;  %p808_p7 = scmp.lt.u32.totalorder %s806_s19, %s801_s9 }
  0x1e   : > { %p804_p3 = pnand %p1072_p2, %p802_p1  ;;  %p810_p10 = scmp.lt.u32.totalorder %s801_s9, %s1059_s5 }
  0x1f   : > { %p809_p8 = por %p808_p7, %p807_p5 }
  0x20   : > { %p805_p4 = pneg %p804_p3 }
  0x21   : > { %p811_p9 = por %p810_p10, %p809_p8 }
  0x23   : > { %p812_p0 = pnand %p811_p9, %p805_p4 }
  0x25   : > { %815 = shalt.err (!%p812_p0)
}
  0x26   : > { %s816_s29 = scalar_lea.vmem %s1063_s7, 512  ;;  %s963_s4 = smov [#allocation5]  }
  0x27   : > { %p817_p1 = scmp.ne.s32.totalorder %s1063_s7, %s816_s29  ;;  %s821_s6 = sshll.u32 %s963_s4, 4  ;;  %s822_s6 = int_to_ptr.vmem [resolvable:$false] %s821_s6 }
  0x28   : > { %s823_s11 = scalar_lea.vmem %s822_s6, 1024  ;;  %p824_p11 = scmp.lt.s32.totalorder %s1063_s7, %s822_s6 }
  0x29   : > { %p819_p3 = pnand %p817_p1, %p1072_p2  ;;  %p825_p6 = scmp.lt.s32.totalorder %s823_s11, %s816_s29 }
  0x2b   : > { %p820_p12 = pneg %p819_p3  ;;  %p826_p5 = por %p825_p6, %p824_p11 }
  0x2d   : > { %p827_p7 = pnand %p826_p5, %p820_p12 }
  0x2f   : > { %830 = shalt.err (!%p827_p7)
}
  0x30   : > { %s1366_s9 = smov 128   ;;  %s1367_s17 = smov 8  }
  0x31   : > { %738 = dma.hbm_to_vmem [thread:$0]  (!%p1049_p13), %s1059_s5, 512, %s1063_s7, %s1066_s8, %s1366_s9, %s1366_s9, %s1367_s17  }
  0x32   : > { %p202_p6 = scmp.lt.s32.totalorder %s961_s15, 3  ;;  %s1375_s0 = sld [smem:[#allocation12_spill]] }
  0x33   : > { %p1376_p9 = scmp.ge.s32.totalorder %s961_s15, 1  ;;  %s148_s4 = scalar_lea.vmem [#allocation2], %s675_s27 }
  0x34   : > { %s155_s6 = sshll.u32 %s148_s4, 4  ;;  %s681_s5 = sshll.u32 %s1045_s25, 3  ;;  %s1115_s6 = int_to_ptr.vmem [resolvable:$true] %s155_s6 }
  0x35   : > { %p1109_p11 = pnand %p1376_p9, %p202_p6  ;;  %s145_s7 = scalar_lea.sflag [#allocation3], %s1045_s25 }
  0x37   : > { %s1377_s29 = scalar_select %p1109_p11, 1, 0 }
  0x38   : > { %s1105_s30 = scalar_lea.hbm %s1375_s0, %s692_s26  ;;  %s836_s20 = scalar_lea.hbm %s1375_s0, 1024 }
  0x39   : > { %s831_s11 = scalar_lea.hbm %s1105_s30, 512  ;;  %p837_p8 = scmp.lt.u32.totalorder %s1105_s30, %s1375_s0 }
  0x3a   : > { %p832_p12 = scmp.ne.s32.totalorder %s1105_s30, %s831_s11  ;;  %p838_p10 = scmp.lt.u32.totalorder %s836_s20, %s831_s11 }
  0x3b   : > { %p840_p3 = scmp.lt.u32.totalorder %s831_s11, %s1105_s30 }
  0x3c   : > { %p834_p0 = pnand %p832_p12, %p1072_p2  ;;  %p839_p1 = por %p838_p10, %p837_p8 }
  0x3e   : > { %p835_p4 = pneg %p834_p0  ;;  %p841_p5 = por %p840_p3, %p839_p1 }
  0x40   : > { %p842_p7 = pnand %p841_p5, %p835_p4 }
  0x42   : > { %845 = shalt.err (!%p842_p7)
}
  0x43   : > { %s846_s27 = scalar_lea.vmem %s1115_s6, 512  ;;  %s966_s4 = smov [#allocation2]  }
  0x44   : > { %p847_p6 = scmp.ne.s32.totalorder %s1115_s6, %s846_s27  ;;  %s851_s26 = sshll.u32 %s966_s4, 4  ;;  %s852_s26 = int_to_ptr.vmem [resolvable:$false] %s851_s26 }
  0x45   : > { %s853_s9 = scalar_lea.vmem %s852_s26, 1024  ;;  %p854_p0 = scmp.lt.s32.totalorder %s1115_s6, %s852_s26 }
  0x46   : > { %p849_p9 = pnand %p847_p6, %p1072_p2  ;;  %p855_p11 = scmp.lt.s32.totalorder %s853_s9, %s846_s27 }
  0x48   : > { %p850_p12 = pneg %p849_p9  ;;  %p856_p8 = por %p855_p11, %p854_p0 }
  0x4a   : > { %p857_p10 = pnand %p856_p8, %p850_p12 }
  0x4c   : > { %860 = shalt.err (!%p857_p10)
}
  0x4d   : > { %s1378_s17 = smov 8   ;;  %s1379_s11 = smov 128  }
  0x4e   : > { %735 = dma.hbm_to_vmem [thread:$0]  (!%p1049_p13), %s1105_s30, 512, %s1115_s6, %s145_s7, %s1379_s11, %s1379_s11, %s1378_s17  }
  0x4f   : > { %s682_s19 = sshll.u32 %s961_s15, 7  ;;  %s190_s26 = scalar_lea.vmem [#allocation7], %s681_s5 }
  0x50   : > { %s1149_s27 = scalar_lea.hbm %s1362_s2, %s682_s19  ;;  %s197_s9 = sshll.u32 %s190_s26, 4  ;;  %s198_s9 = int_to_ptr.vmem [resolvable:$true] %s197_s9 }
  0x51   : > { %s861_s0 = scalar_lea.hbm %s1149_s27, 128  ;;  %s866_s7 = scalar_lea.hbm %s1362_s2, 256 }
  0x52   : > { %p862_p11 = scmp.ne.s32.totalorder %s1149_s27, %s861_s0  ;;  %p867_p3 = scmp.lt.u32.totalorder %s1149_s27, %s1362_s2 }
  0x53   : > { %p868_p5 = scmp.lt.u32.totalorder %s866_s7, %s861_s0  ;;  %p870_p6 = scmp.lt.u32.totalorder %s861_s0, %s1149_s27 }
  0x54   : > { %p864_p4 = pnand %p862_p11, %p1072_p2 }
  0x55   : > { %p869_p7 = por %p868_p5, %p867_p3 }
  0x56   : > { %p865_p1 = pneg %p864_p4 }
  0x57   : > { %p871_p9 = por %p870_p6, %p869_p7 }
  0x59   : > { %p872_p12 = pnand %p871_p9, %p865_p1 }
  0x5b   : > { %875 = shalt.err (!%p872_p12)
}
  0x5c   : > { %s876_s25 = scalar_lea.vmem %s198_s9, 128  ;;  %s967_s5 = smov [#allocation7]  }
  0x5d   : > { %p877_p0 = scmp.ne.s32.totalorder %s198_s9, %s876_s25  ;;  %s881_s19 = sshll.u32 %s967_s5, 4  ;;  %s882_s19 = int_to_ptr.vmem [resolvable:$false] %s881_s19 }
  0x5e   : > { %s883_s20 = scalar_lea.vmem %s882_s19, 256  ;;  %p884_p11 = scmp.lt.s32.totalorder %s198_s9, %s882_s19 }
  0x5f   : > { %p879_p8 = pnand %p877_p0, %p1072_p2  ;;  %p885_p4 = scmp.lt.s32.totalorder %s883_s20, %s876_s25 }
  0x61   : > { %p880_p10 = pneg %p879_p8  ;;  %p886_p13 = por %p885_p4, %p884_p11 }
  0x63   : > { %p887_p3 = pnand %p886_p13, %p880_p10 }
  0x65   : > { %890 = shalt.err (!%p887_p3)
}
  0x66   : > { %p1380_p5 = scmp.ne.s32.totalorder %s1373_s28, 0  ;;  %p1381_p1 = scmp.ne.s32.totalorder %s1377_s29, 0 }
  0x67   : > { %s1174_s0 = sand.u32 (!%p1381_p1), 1, %s953_s13   ;;  %p1382_p13 = scmp.ne.s32.totalorder (!%p1381_p1), %s1370_s22, 0 }
  0x68   : > { %741 = dma.hbm_to_vmem [thread:$0]  (!%p1380_p5), %s1149_s27, 128, %s198_s9, %s1066_s8  }
  0x69   : > { %206 = sbr.rel (%p1381_p1) target bundleno = 925 (0x39d), region = 32  ;;  %s684_s10 = sshll.u32 (!%p1381_p1), %s1174_s0, 5 }
  0x6a   : > { %s209_s4 = scalar_lea.sflag (!%p1381_p1), [#allocation3], %s1174_s0  ;;  %s1178_s26 = scalar_lea.vmem (!%p1381_p1), [#allocation2], %s684_s10 }
  0x70   : > { %936 = dma.done.wait (%p1382_p13), %s209_s4, 512  }
  0x71   : > { %938 = vsyncadd (%p1382_p13), %s209_s4, 4294966784  ;;  %s217_s28 = sand.u32 1, %s1011_s16   ;;  %s221_s29 = scalar_lea.vmem [#allocation5], %s684_s10 }
  0x72   : > { %s218_s8 = scalar_lea.sflag [#allocation6], %s217_s28 }
  0x73   : > { %940 = dma.done.wait (%p1382_p13), %s218_s8, 640  }
  0x74   : > { %942 = vsyncadd (%p1382_p13), %s218_s8, 4294966656  ;;  %s686_s27 = sshll.u32 %s1174_s0, 3  ;;  %v267_v1 = vld [vmem:[%s221_s29] sm:$0xff]  ;;  %v268_v2 = vld [vmem:[%s221_s29 + $0x8] sm:$0xff]  ;;  %s968_s30 = smov 1.0  }
  0x75   : > { %s230_s9 = scalar_lea.vmem [#allocation7], %s686_s27  ;;  %v269_v7 = vld [vmem:[%s221_s29 + $0x10] sm:$0xff]  ;;  %v270_v8 = vld [vmem:[%s221_s29 + $0x18] sm:$0xff]  ;;  %v1193_v9 = vld [vmem:[%s1178_s26] sm:$0xff]  ;;  %v280_v10 = vadd.f32 1e-06, %v267_v1 }
  0x76   : > { %v271_v0 = vld [vmem:[%s230_s9] sm:$0xff]  ;;  %v297_v11 = vadd.f32 1e-06, %v268_v2  ;;  %v314_v12 = vadd.f32 1e-06, %v269_v7  ;;  %v1205_v17 = vld [vmem:[%s1178_s26 + $0x10] sm:$0xff] }
  0x77   : > { %v272_v3 = vunpack.c.0.s8 %v271_v0  ;;  %v273_v4 = vunpack.c.1.s8 %v271_v0  ;;  %v274_v5 = vunpack.c.2.s8 %v271_v0  ;;  %v275_v6 = vunpack.c.3.s8 %v271_v0  ;;  %v1202_v16 = vld [vmem:[%s1178_s26 + $0x8] sm:$0xff]  ;;  %v1210_v20 = vld [vmem:[%s1178_s26 + $0x18] sm:$0xff]  ;;  %p1383_p7 = scmp.ne.s32.totalorder %s1371_s23, 0 }
  0x78   : > { %783 = vrcp.f32 %v280_v10  ;;  %v331_v19 = vadd.f32 1e-06, %v270_v8  ;;  %v291_v43 = vmin.f32 %v1193_v9, 1e+30  ;;  %v292_v44 = vmax.f32 %v1193_v9, -1e+30 }
  0x79   : > { %v1195_v13 = vcvt.s32.f32 %v272_v3  ;;  %v1197_v14 = vcvt.s32.f32 %v273_v4  ;;  %v1199_v15 = vcvt.s32.f32 %v274_v5  ;;  %v1207_v18 = vcvt.s32.f32 %v275_v6 }
  0x7a   : > { %785 = vrcp.f32 %v297_v11  ;;  %v309_v49 = vmax.f32 %v292_v44, %v1202_v16  ;;  %v308_v52 = vmin.f32 %v291_v43, %v1202_v16 }
  0x7b   : > { %v303_v21 = vadd.f32 %v1197_v14, %v1195_v13  ;;  %v289_v22 = vmul.f32 %v1195_v13, %v1193_v9  ;;  %v306_v23 = vmul.f32 %v1197_v14, %v1202_v16  ;;  %787 = vrcp.f32 %v314_v12 }
  0x7c   : > { %v323_v24 = vmul.f32 %v1199_v15, %v1205_v17  ;;  %789 = vrcp.f32 %v331_v19  ;;  %v340_v27 = vmul.f32 %v1207_v18, %v1210_v20  ;;  %v326_v54 = vmax.f32 %v309_v49, %v1205_v17 }
  0x7d   : > { %v320_v25 = vadd.f32 %v303_v21, %v1199_v15  ;;  %v307_v26 = vadd.f32 %v306_v23, %v289_v22  ;;  %v325_v59 = vmin.f32 %v308_v52, %v1205_v17  ;;  %vm285_vm0 = vcmp.gt.f32.partialorder %v1195_v13, 0.0 }
  0x7e   : > { %v343_v57 = vmax.f32 %v326_v54, %v1210_v20  ;;  %vm302_vm1 = vcmp.gt.f32.partialorder %v1197_v14, 0.0  ;;  %vm319_vm2 = vcmp.gt.f32.partialorder %v1199_v15, 0.0  ;;  %vm336_vm3 = vcmp.gt.f32.partialorder %v1207_v18, 0.0 }
  0x7f   : > { %v337_v28 = vadd.f32 %v320_v25, %v1207_v18  ;;  %v324_v29 = vadd.f32 %v323_v24, %v307_v26  ;;  %v342_v61 = vmin.f32 %v325_v59, %v1210_v20 }
  0x81   : > { %348 = vadd.xlane.f32.xlu0 %v337_v28  ;;  %v341_v30 = vadd.f32 %v340_v27, %v324_v29 }
  0x82   : > { %v784_v31 = vpop.eup %783 }
  0x83   : > { %371 = vadd.xlane.f32.xlu1 %v341_v30  ;;  %v282_v33 = vmul.f32 %v784_v31, %v280_v10 }
  0x84   : > { %v786_v32 = vpop.eup %785 }
  0x85   : > { %v788_v34 = vpop.eup %787  ;;  %v299_v35 = vmul.f32 %v786_v32, %v297_v11  ;;  %v283_v37 = vsub.f32 2.0, %v282_v33 }
  0x86   : > { %v790_v36 = vpop.eup %789  ;;  %v316_v38 = vmul.f32 %v788_v34, %v314_v12 }
  0x87   : > { %v300_v39 = vsub.f32 2.0, %v299_v35  ;;  %v333_v40 = vmul.f32 %v790_v36, %v331_v19  ;;  %v1224_v41 = vmul.f32 %v784_v31, %v283_v37  ;;  %381 = vmax.xlane.f32.xlu1 %v343_v57 }
  0x88   : > { %v317_v42 = vsub.f32 2.0, %v316_v38 }
  0x89   : > { %v1228_v45 = vmul.f32 %v786_v32, %v300_v39  ;;  %v334_v46 = vsub.f32 2.0, %v333_v40  ;;  %v287_v47 = vmul.f32 %v1224_v41, %v1195_v13  ;;  %v293_v62 = vsel %vm285_vm0, %v1224_v41, 1e+30 }
  0x8a   : > { %v1232_v48 = vmul.f32 %v788_v34, %v317_v42  ;;  %v295_v63 = vsel %vm285_vm0, %v1224_v41, -1e+30  ;;  %v294_v0 = vmin.f32 %v293_v62, 1e+30 }
  0x8b   : > { %v304_v50 = vmul.f32 %v1228_v45, %v1197_v14  ;;  %v1237_v51 = vmul.f32 %v790_v36, %v334_v46  ;;  %v296_v1 = vmax.f32 %v295_v63, -1e+30  ;;  %v310_v2 = vsel %vm302_vm1, %v1228_v45, 1e+30 }
  0x8c   : > { %v321_v53 = vmul.f32 %v1232_v48, %v1199_v15  ;;  %v312_v3 = vsel %vm302_vm1, %v1228_v45, -1e+30  ;;  %v311_v4 = vmin.f32 %v294_v0, %v310_v2  ;;  %v327_v6 = vsel %vm319_vm2, %v1232_v48, 1e+30 }
  0x8d   : > { %v305_v55 = vadd.f32 %v304_v50, %v287_v47  ;;  %v338_v56 = vmul.f32 %v1237_v51, %v1207_v18  ;;  %v313_v5 = vmax.f32 %v296_v1, %v312_v3  ;;  %v329_v7 = vsel %vm319_vm2, %v1232_v48, -1e+30 }
  0x8e   : > { %v328_v8 = vmin.f32 %v311_v4, %v327_v6  ;;  %v344_v11 = vsel %vm336_vm3, %v1237_v51, 1e+30  ;;  %v346_v12 = vsel %vm336_vm3, %v1237_v51, -1e+30 }
  0x8f   : > { %v322_v58 = vadd.f32 %v321_v53, %v305_v55  ;;  %v330_v10 = vmax.f32 %v313_v5, %v329_v7 }
  0x90   : > { %v345_v19 = vmin.f32 %v328_v8, %v344_v11 }
  0x91   : > { %v339_v60 = vadd.f32 %v338_v56, %v322_v58  ;;  %v347_v21 = vmax.f32 %v330_v10, %v346_v12 }
  0x93   : > { %361 = vadd.xlane.f32.xlu0 %v339_v60  ;;  %404 = vmax.xlane.f32.xlu1 %v347_v21 }
  0x97   : > { %390 = vmin.xlane.f32.xlu0 %v342_v61 }
  0x9b   : > { %413 = vmin.xlane.f32.xlu0 %v345_v19 }
 0x10e   : > { %v349_v22 = vpop.xlane.xlu0 %348 }
 0x10f   : > { %v350_v23 = vrot.slane %v349_v22, 4 }
 0x110   : > { %v372_v29 = vpop.xlane.xlu1 %371 }
 0x111   : > { %v351_v24 = vadd.f32 %v350_v23, %v349_v22  ;;  %v373_v35 = vrot.slane %v372_v29, 4 }
 0x113   : > { %v352_v25 = vrot.slane %v351_v24, 2  ;;  %v374_v39 = vadd.f32 %v373_v35, %v372_v29 }
 0x114   : > { %v382_v31 = vpop.xlane.xlu1 %381 }
 0x115   : > { %v353_v26 = vadd.f32 %v352_v25, %v351_v24  ;;  %v383_v34 = vrot.slane %v382_v31, 4  ;;  %v375_v44 = vrot.slane %v374_v39, 2 }
 0x117   : > { %v354_v27 = vrot.slane %v353_v26, 1  ;;  %v384_v38 = vmax.f32 %v382_v31, %v383_v34  ;;  %v376_v52 = vadd.f32 %v375_v44, %v374_v39 }
 0x119   : > { %v355_v28 = vadd.f32 %v354_v27, %v353_v26  ;;  %v385_v43 = vrot.slane %v384_v38, 2  ;;  %v377_v56 = vrot.slane %v376_v52, 1 }
 0x11b   : > { %694 = vpush %v355_v28  ;;  %v386_v50 = vmax.f32 %v384_v38, %v385_v43  ;;  %v378_v61 = vadd.f32 %v377_v56, %v376_v52 }
 0x11d   : > { %v387_v55 = vrot.slane %v386_v50, 1 }
 0x11f   : > { %v388_v60 = vmax.f32 %v386_v50, %v387_v55 }
 0x120   : > { %v362_v30 = vpop.xlane.xlu0 %361  ;;  %v405_v63 = vpop.xlane.xlu1 %404 }
 0x121   : > { %v363_v33 = vrot.slane %v362_v30, 4  ;;  %v406_v0 = vrot.slane %v405_v63, 4 }
 0x123   : > { %v364_v37 = vadd.f32 %v363_v33, %v362_v30  ;;  %v407_v3 = vmax.f32 %v405_v63, %v406_v0 }
 0x124   : > { %v391_v32 = vpop.xlane.xlu0 %390 }
 0x125   : > { %v392_v36 = vrot.slane %v391_v32, 4  ;;  %v365_v42 = vrot.slane %v364_v37, 2  ;;  %v408_v6 = vrot.slane %v407_v3, 2 }
 0x127   : > { %v393_v40 = vmin.f32 %v391_v32, %v392_v36  ;;  %v366_v49 = vadd.f32 %v365_v42, %v364_v37  ;;  %v409_v43 = vmax.f32 %v407_v3, %v408_v6 }
 0x128   : > { %v414_v1 = vpop.xlane.xlu0 %413 }
 0x129   : > { %v394_v47 = vrot.slane %v393_v40, 2  ;;  %v367_v54 = vrot.slane %v366_v49, 1  ;;  %v415_v2 = vrot.slane %v414_v1, 4 }
 0x12b   : > { %v395_v53 = vmin.f32 %v393_v40, %v394_v47  ;;  %v368_v59 = vadd.f32 %v367_v54, %v366_v49  ;;  %v416_v5 = vmin.f32 %v414_v1, %v415_v2  ;;  %v410_v54 = vrot.slane %v409_v43, 1 }
 0x12d   : > { %v396_v57 = vrot.slane %v395_v53, 1  ;;  %v417_v33 = vrot.slane %v416_v5, 2  ;;  %v411_v56 = vmax.f32 %v409_v43, %v410_v54 }
 0x12f   : > { %v397_v62 = vmin.f32 %v395_v53, %v396_v57  ;;  %v418_v47 = vmin.f32 %v416_v5, %v417_v33 }
 0x131   : > { %v419_v55 = vrot.slane %v418_v47, 1 }
 0x133   : > { %v420_v57 = vmin.f32 %v418_v47, %v419_v55 }
 0x14c   : > { %s1260_s22 = spop %694 }
 0x14d   : > { %s357_s6 = smax.f32 %s968_s30, %s1260_s22 }
 0x14e   : > { %v358_v46 = vstv %s357_s6 }
 0x14f   : > { %791 = vrcp.f32 %v358_v46 }
 0x159   : > { %v792_v58 = vpop.eup %791 }
 0x15a   : > { %696 = vpush %v792_v58 }
 0x15b   : > { %698 = vpush %v368_v59 }
 0x15c   : > { %700 = vpush %v378_v61 }
 0x15d   : > { %702 = vpush %v388_v60 }
 0x15e   : > { %704 = vpush %v397_v62 }
 0x18b   : > { %s1263_s7 = spop %696 }
 0x18c   : > { %s699_s17 = spop %698 }
 0x18d   : > { %s1266_s11 = smul.f32 %s699_s17, %s1263_s7  ;;  %s701_s25 = spop %700 }
 0x18e   : > { %s1269_s5 = smul.f32 %s701_s25, %s1263_s7  ;;  %s703_s19 = spop %702 }
 0x18f   : > { %v427_v4 = vstv %s1266_s11  ;;  %s705_s20 = spop %704 }
 0x190   : > { %v429_v7 = vsub.f32 %v1224_v41, %v427_v4  ;;  %v437_v8 = vsub.f32 %v1228_v45, %v427_v4  ;;  %v445_v10 = vsub.f32 %v1232_v48, %v427_v4  ;;  %v428_v11 = vstv %s1269_s5  ;;  %s399_s10 = ssub.f32 %s703_s19, %s705_s20 }
 0x191   : > { %v433_v12 = vsub.f32 %v1193_v9, %v428_v11  ;;  %v441_v19 = vsub.f32 %v1202_v16, %v428_v11  ;;  %v449_v21 = vsub.f32 %v1205_v17, %v428_v11  ;;  %v453_v22 = vsub.f32 %v1237_v51, %v427_v4 }
 0x192   : > { %v430_v23 = vand.u32 2147483647, %v429_v7  ;;  %v438_v24 = vand.u32 2147483647, %v437_v8  ;;  %v446_v25 = vand.u32 2147483647, %v445_v10  ;;  %v457_v26 = vsub.f32 %v1210_v20, %v428_v11 }
 0x193   : > { %v434_v27 = vand.u32 2147483647, %v433_v12  ;;  %v442_v28 = vand.u32 2147483647, %v441_v19  ;;  %v450_v29 = vand.u32 2147483647, %v449_v21 }
 0x194   : > { %v431_v30 = vmul.f32 %v430_v23, %v1195_v13  ;;  %v439_v31 = vmul.f32 %v438_v24, %v1197_v14  ;;  %v454_v32 = vand.u32 2147483647, %v453_v22  ;;  %s400_s4 = sadd.f32 1e-06, %s399_s10  ;;  %v458_v36 = vand.u32 2147483647, %v457_v26 }
 0x195   : > { %v435_v34 = vmul.f32 %v434_v27, %v1195_v13  ;;  %v443_v35 = vmul.f32 %v442_v28, %v1197_v14  ;;  %v447_v38 = vmul.f32 %v446_v25, %v1199_v15  ;;  %v451_v42 = vmul.f32 %v450_v29, %v1199_v15 }
 0x196   : > { %v440_v37 = vadd.f32 %v439_v31, %v431_v30  ;;  %v401_v39 = vstv %s400_s4  ;;  %v455_v46 = vmul.f32 %v454_v32, %v1207_v18  ;;  %v459_v50 = vmul.f32 %v458_v36, %v1207_v18 }
 0x197   : > { %v444_v40 = vadd.f32 %v443_v35, %v435_v34  ;;  %793 = vrcp.f32 %v401_v39 }
 0x198   : > { %v448_v44 = vadd.f32 %v447_v38, %v440_v37 }
 0x199   : > { %v452_v49 = vadd.f32 %v451_v42, %v444_v40 }
 0x19a   : > { %v456_v52 = vadd.f32 %v455_v46, %v448_v44 }
 0x19b   : > { %v460_v53 = vadd.f32 %v459_v50, %v452_v49 }
 0x19c   : > { %461 = vadd.xlane.f32.xlu1 %v456_v52 }
 0x19d   : > { %471 = vadd.xlane.f32.xlu0 %v460_v53 }
 0x1a1   : > { %v794_v58 = vpop.eup %793 }
 0x1a2   : > { %706 = vpush %v794_v58 }
 0x1a3   : > { %708 = vpush %v411_v56 }
 0x1a4   : > { %710 = vpush %v420_v57 }
 0x1d3   : > { %s1289_s26 = spop %706 }
 0x1d4   : > { %s709_s28 = spop %708 }
 0x1d5   : > { %s711_s8 = spop %710 }
 0x1d6   : > { %s422_s29 = ssub.f32 %s709_s28, %s711_s8 }
 0x1d8   : > { %s423_s9 = sadd.f32 1e-06, %s422_s29 }
 0x1da   : > { %v424_v59 = vstv %s423_s9 }
 0x1db   : > { %795 = vrcp.f32 %v424_v59 }
 0x1e5   : > { %v796_v60 = vpop.eup %795 }
 0x1e6   : > { %712 = vpush %v796_v60 }
 0x217   : > { %s713_s30 = spop %712 }
 0x229   : > { %v462_v61 = vpop.xlane.xlu1 %461 }
 0x22a   : > { %v472_v62 = vpop.xlane.xlu0 %471  ;;  %v463_v63 = vrot.slane %v462_v61, 4 }
 0x22b   : > { %v473_v0 = vrot.slane %v472_v62, 4 }
 0x22c   : > { %v464_v1 = vadd.f32 %v463_v63, %v462_v61 }
 0x22d   : > { %v474_v2 = vadd.f32 %v473_v0, %v472_v62 }
 0x22e   : > { %v465_v3 = vrot.slane %v464_v1, 2 }
 0x22f   : > { %v475_v4 = vrot.slane %v474_v2, 2 }
 0x230   : > { %v466_v5 = vadd.f32 %v465_v3, %v464_v1 }
 0x231   : > { %v476_v6 = vadd.f32 %v475_v4, %v474_v2 }
 0x232   : > { %v467_v7 = vrot.slane %v466_v5, 1 }
 0x233   : > { %v477_v8 = vrot.slane %v476_v6, 1 }
 0x234   : > { %v468_v10 = vadd.f32 %v467_v7, %v466_v5 }
 0x235   : > { %v478_v11 = vadd.f32 %v477_v8, %v476_v6 }
 0x236   : > { %714 = vpush %v468_v10 }
 0x237   : > { %716 = vpush %v478_v11 }
 0x267   : > { %s715_s6 = spop %714 }
 0x268   : > { %s470_s17 = smul.f32 %s715_s6, %s1263_s7  ;;  %s717_s25 = spop %716 }
 0x269   : > { %s480_s19 = smul.f32 %s717_s25, %s1263_s7 }
 0x26a   : > { %s481_s20 = smul.f32 %s713_s30, %s470_s17 }
 0x26b   : > { %s487_s10 = smul.f32 %s1289_s26, %s480_s19 }
 0x26c   : > { %s482_s4 = sadd.f32 1e-06, %s481_s20 }
 0x26d   : > { %s488_s28 = sadd.f32 1e-06, %s487_s10 }
 0x26e   : > { %v483_v12 = vstv %s482_s4 }
 0x26f   : > { %797 = vrcp.f32 %v483_v12  ;;  %v489_v19 = vstv %s488_s28 }
 0x270   : > { %799 = vrcp.f32 %v489_v19 }
 0x279   : > { %v798_v21 = vpop.eup %797 }
 0x27a   : > { %v800_v22 = vpop.eup %799  ;;  %718 = vpush %v798_v21 }
 0x27b   : > { %720 = vpush %v800_v22 }
 0x2ab   : > { %s719_s8 = spop %718 }
 0x2ac   : > { %s486_s29 = smul.f32 %s719_s8, %s713_s30  ;;  %s721_s9 = spop %720 }
 0x2ad   : > { %s492_s6 = smul.f32 %s721_s9, %s1289_s26 }
 0x2ae   : > { %s493_s7 = smul.f32 %s486_s29, %s1266_s11  ;;  %v496_v23 = vstv %s486_s29  ;;  %s689_s11 = sshll.u32 %s1011_s16, 7 }
 0x2af   : > { %v500_v24 = vmul.f32 %v496_v23, %v1224_v41  ;;  %v507_v25 = vmul.f32 %v496_v23, %v1228_v45  ;;  %v514_v26 = vmul.f32 %v496_v23, %v1232_v48  ;;  %s494_s17 = smul.f32 %s492_s6, %s1269_s5  ;;  %v521_v27 = vmul.f32 %v496_v23, %v1237_v51  ;;  %s262_s5 = scalar_lea.vmem [#allocation8], %s686_s27 }
 0x2b0   : > { %v497_v28 = vstv %s492_s6  ;;  %s559_s26 = sshll.u32 %s262_s5, 4  ;;  %s1316_s10 = scalar_lea.hbm %s1363_s3, %s689_s11  ;;  %s1318_s26 = int_to_ptr.vmem [resolvable:$true] %s559_s26 }
 0x2b1   : > { %s495_s25 = ssub.f32 %s493_s7, %s494_s17  ;;  %v499_v29 = vmul.f32 %v497_v28, %v1193_v9  ;;  %v506_v30 = vmul.f32 %v497_v28, %v1202_v16  ;;  %v513_v31 = vmul.f32 %v497_v28, %v1205_v17  ;;  %v520_v32 = vmul.f32 %v497_v28, %v1210_v20  ;;  %s546_s16 = scalar_lea.sflag [#allocation4], %s1174_s0 }
 0x2b2   : > { %s969_s27 = smov [#allocation8]  }
 0x2b3   : > { %v498_v33 = vstv %s495_s25  ;;  %v501_v34 = vsub.f32 %v499_v29, %v500_v24  ;;  %v508_v41 = vsub.f32 %v506_v30, %v507_v25  ;;  %v515_v35 = vsub.f32 %v513_v31, %v514_v26  ;;  %s895_s4 = sshll.u32 %s969_s27, 4  ;;  %s896_s4 = int_to_ptr.vmem [resolvable:$false] %s895_s4 }
 0x2b4   : > { %v522_v45 = vsub.f32 %v520_v32, %v521_v27  ;;  %s897_s28 = scalar_lea.vmem %s896_s4, 256  ;;  %p898_p12 = scmp.lt.s32.totalorder %s1318_s26, %s896_s4 }
 0x2b5   : > { %v502_v36 = vadd.f32 %v501_v34, %v498_v33  ;;  %v509_v48 = vadd.f32 %v508_v41, %v498_v33  ;;  %v516_v37 = vadd.f32 %v515_v35, %v498_v33 }
 0x2b6   : > { %v523_v38 = vadd.f32 %v522_v45, %v498_v33 }
 0x2b7   : > { %v503_v51 = vand.u32 2147483647, %v502_v36  ;;  %v510_v39 = vand.u32 2147483647, %v509_v48  ;;  %v517_v40 = vand.u32 2147483647, %v516_v37 }
 0x2b8   : > { %v524_v42 = vand.u32 2147483647, %v523_v38 }
 0x2b9   : > { %v504_v9 = vmul.f32 %v503_v51, %v1195_v13  ;;  %v511_v16 = vmul.f32 %v510_v39, %v1197_v14  ;;  %v518_v20 = vmul.f32 %v517_v40, %v1199_v15  ;;  %v536_v14 = vlaneseq }
 0x2ba   : > { %v525_v44 = vmul.f32 %v524_v42, %v1207_v18  ;;  %v540_v15 = vstv %s1260_s22  ;;  %s891_s22 = scalar_lea.vmem %s1318_s26, 128 }
 0x2bb   : > { %v512_v17 = vadd.f32 %v511_v16, %v504_v9  ;;  %v537_v55 = vshrl.u32 %v536_v14, 7  ;;  %p892_p2 = scmp.ne.s32.totalorder %s1318_s26, %s891_s22  ;;  %p899_p0 = scmp.lt.s32.totalorder %s897_s28, %s891_s22 }
 0x2bd   : > { %v519_v43 = vadd.f32 %v518_v20, %v512_v17  ;;  %vm539_vm4 = vcmp.eq.s32.totalorder %v537_v55, 1  ;;  %vm538_vm5 = vcmp.eq.s32.totalorder %v537_v55, 0  ;;  %p893_p6 = pnand %p892_p2, %p1383_p7  ;;  %p900_p8 = por %p899_p0, %p898_p12 }
 0x2be   : > { %v541_v18 = vsel %vm539_vm4, %v540_v15, 0.0 }
 0x2bf   : > { %v526_v46 = vadd.f32 %v525_v44, %v519_v43  ;;  %p894_p9 = pneg %p893_p6 }
 0x2c1   : > { %527 = vadd.xlane.f32.xlu1 %v526_v46  ;;  %p901_p10 = pnand %p900_p8, %p894_p9 }
 0x34e   : > { %v528_v47 = vpop.xlane.xlu1 %527 }
 0x34f   : > { %v529_v49 = vrot.slane %v528_v47, 4 }
 0x351   : > { %v530_v50 = vadd.f32 %v529_v49, %v528_v47 }
 0x353   : > { %v531_v52 = vrot.slane %v530_v50, 2 }
 0x355   : > { %v532_v53 = vadd.f32 %v531_v52, %v530_v50 }
 0x357   : > { %v533_v13 = vrot.slane %v532_v53, 1 }
 0x359   : > { %v534_v54 = vadd.f32 %v533_v13, %v532_v53 }
 0x35b   : > { %722 = vpush %v534_v54 }
 0x38c   : > { %s723_s30 = spop %722 }
 0x38d   : > { %v542_v56 = vstv %s723_s30 }
 0x38e   : > { %v543_v57 = vsel %vm538_vm5, %v542_v56, %v541_v18 }
 0x38f   : > { %544 = vst [vmem:[%s262_s5] sm:$0xff] %v543_v57 }
 0x390   : > { %904 = shalt.err (!%p901_p10)
}
 0x391   : > { %s905_s0 = scalar_lea.hbm %s1316_s10, 128  ;;  %s909_s9 = scalar_lea.hbm %s1363_s3, 256 }
 0x392   : > { %p906_p11 = scmp.ne.s32.totalorder %s1316_s10, %s905_s0  ;;  %p910_p5 = scmp.lt.u32.totalorder %s1316_s10, %s1363_s3 }
 0x393   : > { %p911_p1 = scmp.lt.u32.totalorder %s909_s9, %s905_s0  ;;  %p913_p2 = scmp.lt.u32.totalorder %s905_s0, %s1316_s10 }
 0x394   : > { %p907_p4 = pnand %p906_p11, %p1383_p7 }
 0x395   : > { %p912_p13 = por %p911_p1, %p910_p5 }
 0x396   : > { %p908_p3 = pneg %p907_p4 }
 0x397   : > { %p914_p6 = por %p913_p2, %p912_p13 }
 0x399   : > { %p915_p9 = pnand %p914_p6, %p908_p3 }
 0x39b   : > { %918 = shalt.err (!%p915_p9)
}
 0x39c   : > { %730 = dma.vmem_to_hbm [thread:$0]  (%p1383_p7), %s1318_s26, 128, %s1316_s10, %s546_s16  }
 0x39d PF: > { %s571_s17 = sand.u32 1, %s949_s12   ;;  %p1384_p12 = scmp.ne.s32.totalorder %s1372_s24, 0 }
 0x39e   : > { %p1385_p0 = scmp.ge.s32.totalorder %s961_s15, 2  ;;  %s572_s25 = scalar_lea.sflag [#allocation4], %s571_s17 }
 0x3a0   : > { %p743_p8 = pnand %p1385_p0, %p1384_p12 }
 0x3a2   : > { %944 = dma.done.wait (!%p743_p8), %s572_s25, 128  }
 0x3a3   : > { %946 = vsyncadd (!%p743_p8), %s572_s25, 4294967168  ;;  %p19_p10 = scmp.ge.s32.totalorder %s1015_s18, 4   ;;  %s1386_s12 = smov %s953_s13 }
 0x3a4   : > { %s1387_s13 = smov %s957_s14  ;;  %s1388_s14 = smov %s1027_s21 }
 0x3a5   : > { %s1389_s15 = smov %s1015_s18  ;;  %21 = sbr.rel (!%p19_p10) target bundleno = 9 (0x9), region = 101 }
 0x3ac   :  { %577 = vsyncpa [#allocation3], 1 }
 0x3ad   :  { %579 = vsyncpa [#allocation3 + $0x1], 1 }
 0x3ae   :  { %580 = vsyncpa [#allocation6], 1 }
 0x3af   :  { %582 = vsyncpa [#allocation6 + $0x1], 1 }
 0x3b0   :  { %583 = vsyncpa [#allocation4], 1 }
 0x3b1   :  { %585 = vsyncpa [#allocation4 + $0x1], 1 }

</bundles_post_ra>
